<compile_context>
chip_gen: v6e
topology: v6e:2x2x1
jax: 0.10.0
libtpu: 0.0.40
codegen_flags: <defaults>
</compile_context>

<pallas_src>
import jax
import jax.numpy as jnp
from jax.experimental import pallas as pl
from jax.experimental.pallas import tpu as pltpu

# ----------------------------- configuration --------------------------------
N_LAYERS = 4          # number of MLP layers (module default)
LATENT_DIM = 16       # latent noise dimension
IMG_DIM = 8           # const.n_hfp_feat  (== hfp_tgt feature dim)
HIDDEN_DIM = 128      # MLP hidden dim (module default -> 128-lane dense)
D_MODEL = 32          # transformer.d_model
N_DR_FEAT = 8         # driver feature dim
N_BV_FEAT = 8         # bv feature dim
N_ALT = 8             # number of altitudes
N_WAVE = 8            # number of waves
BATCH = 2

COND_DIM = D_MODEL + LATENT_DIM              # 48: real MLP input width
GATE_LANE = D_MODEL                          # 32: gate-logit lane in the cond slab
COND_SLAB = 64                               # streamed bf16 input slab width
OUT_PAD = 128                                # lane-dense output slab width
GATE_COL = IMG_DIM                           # slab column carrying the sigmoid gate
W_ROWS = COND_SLAB + N_LAYERS * HIDDEN_DIM   # 576 rows in the packed weight stack
B_ROWS = 8                                   # bias stack rows (5 used, padded to 8)

# Gate column must land in the zero-padded region of w4/b4 (review concern).
assert IMG_DIM <= GATE_COL < OUT_PAD
assert GATE_LANE + 1 + LATENT_DIM <= COND_SLAB
assert HIDDEN_DIM == OUT_PAD  # uniform width lets all weights share one stack


def _round_up(x, m):
    return ((x + m - 1) // m) * m


def _cdiv(a, b):
    return -(-a // b)


# ------------------------- deterministic init -------------------------------
def xavier_uniform(key, fan_in, fan_out):
    a = (6.0 / (fan_in + fan_out)) ** 0.5
    return jax.random.uniform(key, (fan_in, fan_out), jnp.float32, -a, a)


def linear_bias(key, fan_in, fan_out):
    # nn.Linear default bias init (xavier in _reset_parameters only hits >1-dim params)
    bound = 1.0 / (fan_in ** 0.5)
    return jax.random.uniform(key, (1, fan_out), jnp.float32, -bound, bound)


def make_params(key):
    keys = jax.random.split(key, 13)
    # gen_model: Linear(cond,hid)+ReLU, (n_layers-1)x[Linear(hid,hid)+ReLU], Linear(hid,img)
    dims = [COND_DIM] + [HIDDEN_DIM] * N_LAYERS + [IMG_DIM]
    ws, bs = [], []
    for i in range(len(dims) - 1):
        ws.append(xavier_uniform(keys[2 * i], dims[i], dims[i + 1]))
        bs.append(linear_bias(keys[2 * i + 1], dims[i], dims[i + 1]))
    # transformer stub params (xavier on >1-dim params, as in _reset_parameters)
    trans = {
        "w_dr": xavier_uniform(keys[10], N_DR_FEAT, D_MODEL + 1),
        "w_bv": xavier_uniform(keys[11], N_BV_FEAT, D_MODEL + 1),
        "w_tgt": xavier_uniform(keys[12], IMG_DIM, D_MODEL + 1),
    }
    return {"ws": ws, "bs": bs, "trans": trans}


def prep_kernel_params(params):
    """Pack gen_model weights into 2 kernel refs:
       w_all (576,128) bf16 = [w0_packed | w1 | w2 | w3 | w4_padded]
       b_all (8,128)   f32  = [b0; b1; b2; b3; b4_padded; 0; 0; 0]"""
    ws, bs = params["ws"], params["bs"]
    # layer-0 weight laid out against the cond-slab lanes:
    #   rows [0,32) <- est part, row 32 <- 0 (gate lane), rows [33,49) <- noise part,
    #   rows [49,64) <- 0 (lane padding).  Zero rows keep the fused concat exact.
    w0p = jnp.zeros((COND_SLAB, HIDDEN_DIM), jnp.float32)
    w0p = w0p.at[:D_MODEL].set(ws[0][:D_MODEL])
    w0p = w0p.at[GATE_LANE + 1:GATE_LANE + 1 + LATENT_DIM].set(ws[0][D_MODEL:])
    # output weight/bias zero-padded to 128 lanes (zeros keep GATE_COL clean)
    w4p = jnp.zeros((HIDDEN_DIM, OUT_PAD), jnp.float32).at[:, :IMG_DIM].set(ws[N_LAYERS])
    b4p = jnp.zeros((1, OUT_PAD), jnp.float32).at[:, :IMG_DIM].set(bs[N_LAYERS])

    w_all = jnp.concatenate([w0p, ws[1], ws[2], ws[3], w4p], axis=0).astype(jnp.bfloat16)
    b_all = jnp.zeros((B_ROWS, OUT_PAD), jnp.float32)
    for i in range(N_LAYERS):
        b_all = b_all.at[i, :HIDDEN_DIM].set(bs[i][0])
    b_all = b_all.at[N_LAYERS].set(b4p[0])
    assert w_all.shape == (W_ROWS, OUT_PAD)
    return w_all, b_all


# ------------------------- transformer stand-in ------------------------------
def transformer_stub(tp, driver_src, bv_src, hfp_tgt):
    # TODO(synk): the real encoder/decoder transformer is an external module;
    # this deterministic linear stand-in produces est_hfp of shape
    # (n_batch, n_wave, d_model + 1) with the same downstream semantics.
    dr = driver_src @ tp["w_dr"]                     # (B, d_model+1)
    bv = jnp.mean(bv_src, axis=1) @ tp["w_bv"]       # (B, d_model+1)
    tgt = hfp_tgt @ tp["w_tgt"]                      # (B, W, d_model+1)
    est_hfp = jnp.tanh(tgt + dr[:, None, :] + bv[:, None, :])
    return None, est_hfp


# ------------------------------ Pallas kernel --------------------------------
def gen_mlp_kernel(cond_ref, w_ref, b_ref, out_ref):
    """Fused gen_model MLP (Linear+ReLU x4, Linear) + sigmoid gate.

    cond_ref : (T, 64) bf16  [est[:, :32] | gate_logit | noise | zero pad]
    w_ref    : (576, 128) bf16 packed weight stack (static-sliced per layer)
    b_ref    : (8, 128) f32 packed bias stack
    out_ref  : (T, 128) bf16 output slab; cols [0, IMG_DIM) = g_hfp,
               col GATE_COL = sigmoid gate.  One unmasked lane-dense store."""
    cond = cond_ref[...]                                           # (T, 64) bf16

    # layer 0: fused [est | gate | noise | pad] @ w0_packed  (+ bias, ReLU in f32)
    h = jnp.dot(cond, w_ref[0:COND_SLAB, :],
                preferred_element_type=jnp.float32)
    h = jnp.maximum(h + b_ref[0:1, :], 0.0)

    # layers 1..n_layers-1: Linear(hidden, hidden) + ReLU (bf16 MXU, f32 epilogue)
    for l in range(1, N_LAYERS):
        r0 = COND_SLAB + (l - 1) * HIDDEN_DIM
        h = jnp.dot(h.astype(jnp.bfloat16), w_ref[r0:r0 + HIDDEN_DIM, :],
                    preferred_element_type=jnp.float32)
        h = jnp.maximum(h + b_ref[l:l + 1, :], 0.0)

    # output layer into the 128-lane padded slab
    r0 = COND_SLAB + (N_LAYERS - 1) * HIDDEN_DIM
    y = jnp.dot(h.astype(jnp.bfloat16), w_ref[r0:r0 + HIDDEN_DIM, :],
                preferred_element_type=jnp.float32) + b_ref[N_LAYERS:N_LAYERS + 1, :]

    # sigmoid gate (EUP slot) merged into column GATE_COL (zero-padded -> safe)
    gate = jax.nn.sigmoid(cond[:, GATE_LANE:GATE_LANE + 1].astype(jnp.float32))
    col = jax.lax.broadcasted_iota(jnp.int32, y.shape, 1)
    out_ref[...] = jnp.where(col == GATE_COL, gate, y).astype(out_ref.dtype)


def run_gen_mlp(cond_slab, w_all, b_all, *, max_row_tile=2048):
    n = cond_slab.shape[0]
    n16 = _round_up(max(n, 16), 16)
    num_tiles = _cdiv(n16, max_row_tile)
    if n16 >= 256:
        num_tiles = max(num_tiles, 2)   # >=2 grid steps -> both v7x TCs are used
    row_tile = _round_up(_cdiv(n16, num_tiles), 16)
    n_pad = row_tile * num_tiles
    if n_pad != n:
        cond_slab = jnp.pad(cond_slab, ((0, n_pad - n), (0, 0)))

    out = pl.pallas_call(
        gen_mlp_kernel,
        out_shape=jax.ShapeDtypeStruct((n_pad, OUT_PAD), jnp.bfloat16),
        grid=(num_tiles,),
        in_specs=[
            pl.BlockSpec((row_tile, COND_SLAB), lambda i: (i, 0)),  # streamed rows
            pl.BlockSpec((W_ROWS, OUT_PAD), lambda i: (0, 0)),      # resident weights
            pl.BlockSpec((B_ROWS, OUT_PAD), lambda i: (0, 0)),      # resident biases
        ],
        out_specs=pl.BlockSpec((row_tile, OUT_PAD), lambda i: (i, 0)),
        compiler_params=pltpu.CompilerParams(
            dimension_semantics=("parallel",),      # shard row tiles across TCs
            vmem_limit_bytes=32 * 1024 * 1024,
        ),
    )(cond_slab, w_all, b_all)
    return out[:n]


# ----------------------------- forward (wrapper) -----------------------------
def hfp_generator_forward(params, kparams, driver_src, bv_src, hfp_tgt, noise):
    w_all, b_all = kparams
    _, est_hfp = transformer_stub(params["trans"], driver_src, bv_src, hfp_tgt)
    B, W, F = hfp_tgt.shape
    est_flat = est_hfp.reshape(B * W, D_MODEL + 1)   # free contiguous reshape
    pad = jnp.zeros((B * W, COND_SLAB - (D_MODEL + 1) - LATENT_DIM), jnp.float32)
    cond_slab = jnp.concatenate([est_flat, noise, pad], axis=1).astype(jnp.bfloat16)
    slab = run_gen_mlp(cond_slab, w_all, b_all)      # (B*W, 128) bf16 slab
    g_hfp = slab[:, :IMG_DIM].astype(jnp.float32).reshape(B, W, F)
    g_b = slab[:, GATE_COL].astype(jnp.float32)
    return g_hfp, g_b


# ------------------------------ pure-JAX reference ---------------------------
def gen_mlp_ref(params, est_flat, noise):
    ws, bs = params["ws"], params["bs"]
    x = jnp.concatenate([est_flat[:, :D_MODEL], noise], axis=1)
    for i in range(N_LAYERS):
        x = jnp.maximum(x @ ws[i] + bs[i], 0.0)
    g_hfp = x @ ws[N_LAYERS] + bs[N_LAYERS]
    g_b = jax.nn.sigmoid(est_flat[:, D_MODEL])
    return g_hfp, g_b


# ---------------------------------- main -------------------------------------
if __name__ == "__main__":
    key = jax.random.PRNGKey(0)
    k_par, k_dr, k_bv, k_tgt, k_noise = jax.random.split(key, 5)

    params = make_params(k_par)
    kparams = prep_kernel_params(params)

    driver_src = jax.random.normal(k_dr, (BATCH, N_DR_FEAT), jnp.float32)
    bv_src = jax.random.normal(k_bv, (BATCH, N_ALT, N_BV_FEAT), jnp.float32)
    hfp_tgt = jax.random.normal(k_tgt, (BATCH, N_WAVE, IMG_DIM), jnp.float32)
    noise = jax.random.normal(k_noise, (BATCH * N_WAVE, LATENT_DIM), jnp.float32)

    g_hfp, g_b = hfp_generator_forward(params, kparams,
                                       driver_src, bv_src, hfp_tgt, noise)
    jax.block_until_ready((g_hfp, g_b))

    assert g_hfp.shape == (BATCH, N_WAVE, IMG_DIM)
    assert g_b.shape == (BATCH * N_WAVE,)

    # validate against a pure-JAX f32 reference (bf16 MXU / bf16 store tolerance)
    _, est_hfp = transformer_stub(params["trans"], driver_src, bv_src, hfp_tgt)
    est_flat = est_hfp.reshape(BATCH * N_WAVE, D_MODEL + 1)
    ref_hfp, ref_b = gen_mlp_ref(params, est_flat, noise)
    err_hfp = float(jnp.max(jnp.abs(g_hfp.reshape(-1, IMG_DIM) - ref_hfp)))
    err_b = float(jnp.max(jnp.abs(g_b - ref_b)))
    assert err_hfp < 5e-2 and err_b < 5e-2, (err_hfp, err_b)

    print("KERNEL_OK")
</pallas_src>

<mosaic_0001>
module attributes {stable_mosaic.version = 11 : i64} {
  func.func @gen_mlp_kernel(%arg0: i32, %arg1: memref<16x64xbf16, #tpu.memory_space<vmem>>, %arg2: memref<576x128xbf16, #tpu.memory_space<vmem>>, %arg3: memref<8x128xf32, #tpu.memory_space<vmem>>, %arg4: memref<16x128xbf16, #tpu.memory_space<vmem>>) attributes {dimension_semantics = [#tpu.dimension_semantics<parallel>], iteration_bounds = array<i64: 1>, scalar_prefetch = 0 : i64, scratch_operands = 0 : i64, tpu.core_type = #tpu.core_type<tc>, window_params = [{transform_indices = @transform_0, window_bounds = array<i64: 16, 64>}, {pipeline_mode = #tpu.pipeline_mode<synchronous>, transform_indices = @transform_1, window_bounds = array<i64: 576, 128>}, {pipeline_mode = #tpu.pipeline_mode<synchronous>, transform_indices = @transform_2, window_bounds = array<i64: 8, 128>}, {transform_indices = @transform_3, window_bounds = array<i64: 16, 128>}]} {
    %c0 = arith.constant 0 : index
    %c0_0 = arith.constant 0 : index
    %0 = vector.load %arg1[%c0, %c0_0] : memref<16x64xbf16, #tpu.memory_space<vmem>>, vector<16x64xbf16>
    %c0_1 = arith.constant 0 : index
    %c0_2 = arith.constant 0 : index
    %1 = vector.load %arg2[%c0_1, %c0_2] : memref<576x128xbf16, #tpu.memory_space<vmem>>, vector<64x128xbf16>
    %cst = arith.constant dense<0.000000e+00> : vector<16x128xf32>
    %2 = tpu.matmul %0, %1, %cst {dimension_numbers = #tpu.dot_dimension_numbers<[1], [0], [0], [1], [0, 0, 1, 1], [], []>} : vector<16x64xbf16>, vector<64x128xbf16>, vector<16x128xf32> -> vector<16x128xf32>
    %c0_3 = arith.constant 0 : index
    %c0_4 = arith.constant 0 : index
    %3 = vector.load %arg3[%c0_3, %c0_4] : memref<8x128xf32, #tpu.memory_space<vmem>>, vector<1x128xf32>
    %4 = vector.broadcast %3 : vector<1x128xf32> to vector<16x128xf32>
    %5 = arith.addf %2, %4 : vector<16x128xf32>
    %cst_5 = arith.constant 0.000000e+00 : f32
    %6 = vector.broadcast %cst_5 : f32 to vector<16x128xf32>
    %7 = arith.maximumf %5, %6 : vector<16x128xf32>
    %8 = arith.truncf %7 : vector<16x128xf32> to vector<16x128xbf16>
    %c64 = arith.constant 64 : index
    %c0_6 = arith.constant 0 : index
    %9 = vector.load %arg2[%c64, %c0_6] : memref<576x128xbf16, #tpu.memory_space<vmem>>, vector<128x128xbf16>
    %cst_7 = arith.constant dense<0.000000e+00> : vector<16x128xf32>
    %10 = tpu.matmul %8, %9, %cst_7 {dimension_numbers = #tpu.dot_dimension_numbers<[1], [0], [0], [1], [0, 0, 1, 1], [], []>} : vector<16x128xbf16>, vector<128x128xbf16>, vector<16x128xf32> -> vector<16x128xf32>
    %c1 = arith.constant 1 : index
    %c0_8 = arith.constant 0 : index
    %11 = vector.load %arg3[%c1, %c0_8] : memref<8x128xf32, #tpu.memory_space<vmem>>, vector<1x128xf32>
    %12 = vector.broadcast %11 : vector<1x128xf32> to vector<16x128xf32>
    %13 = arith.addf %10, %12 : vector<16x128xf32>
    %cst_9 = arith.constant 0.000000e+00 : f32
    %14 = vector.broadcast %cst_9 : f32 to vector<16x128xf32>
    %15 = arith.maximumf %13, %14 : vector<16x128xf32>
    %16 = arith.truncf %15 : vector<16x128xf32> to vector<16x128xbf16>
    %c192 = arith.constant 192 : index
    %c0_10 = arith.constant 0 : index
    %17 = vector.load %arg2[%c192, %c0_10] : memref<576x128xbf16, #tpu.memory_space<vmem>>, vector<128x128xbf16>
    %cst_11 = arith.constant dense<0.000000e+00> : vector<16x128xf32>
    %18 = tpu.matmul %16, %17, %cst_11 {dimension_numbers = #tpu.dot_dimension_numbers<[1], [0], [0], [1], [0, 0, 1, 1], [], []>} : vector<16x128xbf16>, vector<128x128xbf16>, vector<16x128xf32> -> vector<16x128xf32>
    %c2 = arith.constant 2 : index
    %c0_12 = arith.constant 0 : index
    %19 = vector.load %arg3[%c2, %c0_12] : memref<8x128xf32, #tpu.memory_space<vmem>>, vector<1x128xf32>
    %20 = vector.broadcast %19 : vector<1x128xf32> to vector<16x128xf32>
    %21 = arith.addf %18, %20 : vector<16x128xf32>
    %cst_13 = arith.constant 0.000000e+00 : f32
    %22 = vector.broadcast %cst_13 : f32 to vector<16x128xf32>
    %23 = arith.maximumf %21, %22 : vector<16x128xf32>
    %24 = arith.truncf %23 : vector<16x128xf32> to vector<16x128xbf16>
    %c320 = arith.constant 320 : index
    %c0_14 = arith.constant 0 : index
    %25 = vector.load %arg2[%c320, %c0_14] : memref<576x128xbf16, #tpu.memory_space<vmem>>, vector<128x128xbf16>
    %cst_15 = arith.constant dense<0.000000e+00> : vector<16x128xf32>
    %26 = tpu.matmul %24, %25, %cst_15 {dimension_numbers = #tpu.dot_dimension_numbers<[1], [0], [0], [1], [0, 0, 1, 1], [], []>} : vector<16x128xbf16>, vector<128x128xbf16>, vector<16x128xf32> -> vector<16x128xf32>
    %c3 = arith.constant 3 : index
    %c0_16 = arith.constant 0 : index
    %27 = vector.load %arg3[%c3, %c0_16] : memref<8x128xf32, #tpu.memory_space<vmem>>, vector<1x128xf32>
    %28 = vector.broadcast %27 : vector<1x128xf32> to vector<16x128xf32>
    %29 = arith.addf %26, %28 : vector<16x128xf32>
    %cst_17 = arith.constant 0.000000e+00 : f32
    %30 = vector.broadcast %cst_17 : f32 to vector<16x128xf32>
    %31 = arith.maximumf %29, %30 : vector<16x128xf32>
    %32 = arith.truncf %31 : vector<16x128xf32> to vector<16x128xbf16>
    %c448 = arith.constant 448 : index
    %c0_18 = arith.constant 0 : index
    %33 = vector.load %arg2[%c448, %c0_18] : memref<576x128xbf16, #tpu.memory_space<vmem>>, vector<128x128xbf16>
    %cst_19 = arith.constant dense<0.000000e+00> : vector<16x128xf32>
    %34 = tpu.matmul %32, %33, %cst_19 {dimension_numbers = #tpu.dot_dimension_numbers<[1], [0], [0], [1], [0, 0, 1, 1], [], []>} : vector<16x128xbf16>, vector<128x128xbf16>, vector<16x128xf32> -> vector<16x128xf32>
    %c4 = arith.constant 4 : index
    %c0_20 = arith.constant 0 : index
    %35 = vector.load %arg3[%c4, %c0_20] : memref<8x128xf32, #tpu.memory_space<vmem>>, vector<1x128xf32>
    %36 = vector.broadcast %35 : vector<1x128xf32> to vector<16x128xf32>
    %37 = arith.addf %34, %36 : vector<16x128xf32>
    %38 = vector.extract_strided_slice %0 {offsets = [0, 32], sizes = [16, 1], strides = [1, 1]} : vector<16x64xbf16> to vector<16x1xbf16>
    %39 = arith.extf %38 : vector<16x1xbf16> to vector<16x1xf32>
    %40 = arith.negf %39 : vector<16x1xf32>
    %41 = math.exp %40 : vector<16x1xf32>
    %cst_21 = arith.constant 1.000000e+00 : f32
    %42 = vector.broadcast %cst_21 : f32 to vector<16x1xf32>
    %43 = arith.addf %42, %41 : vector<16x1xf32>
    %44 = arith.divf %42, %43 : vector<16x1xf32>
    %45 = tpu.iota {dimensions = array<i32: 1>} : vector<16x128xi32>
    %c8_i32 = arith.constant 8 : i32
    %46 = vector.broadcast %c8_i32 : i32 to vector<16x128xi32>
    %47 = arith.cmpi eq, %45, %46 : vector<16x128xi32>
    %48 = vector.shape_cast %44 : vector<16x1xf32> to vector<16x1xf32>
    %49 = vector.broadcast %48 : vector<16x1xf32> to vector<16x128xf32>
    %50 = arith.select %47, %49, %37 : vector<16x128xi1>, vector<16x128xf32>
    %51 = arith.truncf %50 : vector<16x128xf32> to vector<16x128xbf16>
    %c0_22 = arith.constant 0 : index
    %c0_23 = arith.constant 0 : index
    %52 = vector.load %arg4[%c0_22, %c0_23] : memref<16x128xbf16, #tpu.memory_space<vmem>>, vector<16x128xbf16>
    tpu.vector_store %arg4[%c0_22, %c0_23], %51 {strides = array<i32>} : memref<16x128xbf16, #tpu.memory_space<vmem>>, vector<16x128xbf16>,
    return
  }
  func.func @transform_0(%arg0: i32) -> (i32, i32) {
    %c0_i32 = arith.constant 0 : i32
    %c0_i32_0 = arith.constant 0 : i32
    return %arg0, %c0_i32 : i32, i32
  }
  func.func @transform_1(%arg0: i32) -> (i32, i32) {
    %c0_i32 = arith.constant 0 : i32
    %c0_i32_0 = arith.constant 0 : i32
    %c0_i32_1 = arith.constant 0 : i32
    return %c0_i32, %c0_i32_0 : i32, i32
  }
  func.func @transform_2(%arg0: i32) -> (i32, i32) {
    %c0_i32 = arith.constant 0 : i32
    %c0_i32_0 = arith.constant 0 : i32
    %c0_i32_1 = arith.constant 0 : i32
    return %c0_i32, %c0_i32_0 : i32, i32
  }
  func.func @transform_3(%arg0: i32) -> (i32, i32) {
    %c0_i32 = arith.constant 0 : i32
    %c0_i32_0 = arith.constant 0 : i32
    return %arg0, %c0_i32 : i32, i32
  }
}

</mosaic_0001>

<bundles_post_ra>
// kernel: tpu_custom_call.1
= control target key start
LH: loop header
LB: loop body
LE: loop exit
PB: predicated region body
PF: predicated region fallthrough
CT: control target
= control target key end

     0   :  { %8 = vsyncpa [#allocation3], 0  ;;  %s1088_s0 = inlined_call_operand.hbm [shape: bf16[16,64], index: 0, kind: input, shape index: {}]   ;;  %s1089_s1 = inlined_call_operand.hbm [shape: bf16[576,128], index: 1, kind: input, shape index: {}]   ;;  %s1090_s2 = inlined_call_operand.hbm [shape: f32[8,128], index: 2, kind: input, shape index: {}]   ;;  %s1091_s3 = inlined_call_operand.hbm [shape: bf16[16,128], index: 3, kind: output, shape index: {}]  }
   0x1   :  { %9 = vsyncpa [#allocation6], 0 }
   0x2   :  { %10 = vsyncpa [#allocation4], 0  ;;  %s987_s12 = smov [#allocation5]   ;;  %s988_s14 = smov [#allocation2]  }
   0x3   :  { %s28_s13 = sshll.u32 %s987_s12, 4  ;;  %s16_s15 = sshll.u32 %s988_s14, 4  ;;  %s29_s13 = int_to_ptr.vmem [resolvable:$true] %s28_s13  ;;  %s17_s15 = int_to_ptr.vmem [resolvable:$true] %s16_s15 }
   0x4   :  { %s909_s16 = scalar_lea.vmem %s29_s13, 4608  ;;  %p914_p1 = scmp.lt.s32.totalorder %s29_s13, %s29_s13 }
   0x5   :  { %p910_p0 = scmp.ne.s32.totalorder %s29_s13, %s909_s16  ;;  %p915_p2 = scmp.lt.s32.totalorder %s909_s16, %s909_s16 }
   0x7   :  { %p916_p3 = por %p915_p2, %p914_p1 }
   0x9   :  { %p917_p4 = pnand %p916_p3, %p910_p0 }
   0xb   :  { %920 = shalt.err (!%p917_p4)
}
   0xc   :  { %s989_s17 = smov 64   ;;  %s990_s18 = smov 4  }
   0xd   :  { %34 = dma.hbm_to_vmem [thread:$0]  %s1089_s1, 4608, %s29_s13, [#allocation6], %s989_s17, %s989_s17, %s990_s18  }
   0xe   :  { %s929_s21 = scalar_lea.vmem %s17_s15, 128  ;;  %p934_p6 = scmp.lt.s32.totalorder %s17_s15, %s17_s15 }
   0xf   :  { %p930_p5 = scmp.ne.s32.totalorder %s17_s15, %s929_s21  ;;  %p935_p7 = scmp.lt.s32.totalorder %s929_s21, %s929_s21 }
  0x11   :  { %p936_p8 = por %p935_p7, %p934_p6 }
  0x13   :  { %p937_p9 = pnand %p936_p8, %p930_p5 }
  0x15   :  { %940 = shalt.err (!%p937_p9)
}
  0x16   :  { %22 = dma.hbm_to_vmem [thread:$0]  %s1088_s0, 128, %s17_s15, [#allocation3], %s989_s17, %s989_s17, %s990_s18  }
  0x17   :  { %s991_s24 = smov [#allocation7]  }
  0x18   :  { %s41_s25 = sshll.u32 %s991_s24, 4  ;;  %s42_s25 = int_to_ptr.vmem [resolvable:$true] %s41_s25 }
  0x19   :  { %s949_s26 = scalar_lea.vmem %s42_s25, 128  ;;  %p954_p11 = scmp.lt.s32.totalorder %s42_s25, %s42_s25 }
  0x1a   :  { %p950_p10 = scmp.ne.s32.totalorder %s42_s25, %s949_s26  ;;  %p955_p12 = scmp.lt.s32.totalorder %s949_s26, %s949_s26 }
  0x1c   :  { %p956_p13 = por %p955_p12, %p954_p11 }
  0x1e   :  { %p957_p0 = pnand %p956_p13, %p950_p10 }
  0x20   :  { %960 = shalt.err (!%p957_p0)
}
  0x21   :  { %44 = dma.hbm_to_vmem [thread:$0]  %s1090_s2, 128, %s42_s25, [#allocation6]  }
  0x22   :  { %981 = dma.done.wait [#allocation3], 128  }
  0x23   :  { %982 = vsyncadd [#allocation3], 4294967168 }
  0x24   :  { %983 = dma.done.wait [#allocation6], 4736  }
  0x25   :  { %984 = vsyncadd [#allocation6], 4294962560  ;;  %v992_v0 = vmov 0.0   ;;  %vm993_vm0 = vmmov 0   ;;  %v855_v1 = vld [vmem:[#allocation5 + $0x18] sm:$0xff]   ;;  %v856_v2 = vld [vmem:[#allocation5 + $0x10] sm:$0xff]  }
  0x26   :  { %748 = vmatprep.subr.bf16.mxu0 %v992_v0  ;;  %756 = vmatprep.mubr.msk.bf16.mxu0 %vm993_vm0, %v992_v0  ;;  %v860_v3 = vld [vmem:[#allocation5 + $0x58] sm:$0xff]   ;;  %v857_v4 = vld [vmem:[#allocation5 + $0x8] sm:$0xff]   ;;  %v861_v5 = vld [vmem:[#allocation5 + $0x50] sm:$0xff]   ;;  %vm99_vm1 = vcmask 523264   ;;  %s995_s0 = smov [#allocation8]  }
  0x27   :  { %760 = vmatprep.subr.bf16.mxu1 %v992_v0  ;;  %776 = vmatprep.mubr.msk.bf16.mxu1 %vm993_vm0, %v992_v0  ;;  %v858_v6 = vld [vmem:[#allocation5] sm:$0xff]   ;;  %v1040_v7 = vld [vmem:[#allocation2] sm:$0xff]   ;;  %v862_v8 = vld [vmem:[#allocation5 + $0x48] sm:$0xff]   ;;  %s640_s2 = sshll.u32 %s995_s0, 4  ;;  %s641_s2 = int_to_ptr.vmem [resolvable:$true] %s640_s2 }
  0x28   :  { %749 = vmatpush3.bf16.msra.mxu0 %v855_v1  ;;  %761 = vmatpush3.bf16.msra.mxu1 %v860_v3  ;;  %v863_v9 = vld [vmem:[#allocation5 + $0x40] sm:$0xff]   ;;  %v864_v10 = vld [vmem:[#allocation5 + $0x38] sm:$0xff]   ;;  %v865_v11 = vld [vmem:[#allocation5 + $0x30] sm:$0xff]   ;;  %v597_v3 = vunpack.c.h.bf16 %v1040_v7  ;;  %s961_s28 = scalar_lea.vmem %s641_s2, 128  ;;  %p966_p2 = scmp.lt.s32.totalorder %s641_s2, %s641_s2 }
  0x29   :  { %750 = vmatprep.subr.bf16.mxu0 %v992_v0  ;;  %762 = vmatprep.subr.bf16.mxu1 %v992_v0  ;;  %v866_v12 = vld [vmem:[#allocation5 + $0x28] sm:$0xff]   ;;  %v867_v13 = vld [vmem:[#allocation5 + $0x20] sm:$0xff]   ;;  %v868_v14 = vld [vmem:[#allocation5 + $0x98] sm:$0xff]   ;;  %p962_p1 = scmp.ne.s32.totalorder %s641_s2, %s961_s28  ;;  %p967_p3 = scmp.lt.s32.totalorder %s961_s28, %s961_s28 }
  0x2a   :  { %v869_v15 = vld [vmem:[#allocation5 + $0x90] sm:$0xff]   ;;  %v870_v16 = vld [vmem:[#allocation5 + $0x88] sm:$0xff]   ;;  %v871_v17 = vld [vmem:[#allocation5 + $0x80] sm:$0xff]  }
  0x2b   :  { %v872_v18 = vld [vmem:[#allocation5 + $0x78] sm:$0xff]   ;;  %v653_v19 = vld [vmem:[#allocation7] ss:$0 sm:$0xff]  ;;  %v873_v29 = vld [vmem:[#allocation5 + $0x70] sm:$0xff]   ;;  %p968_p4 = por %p967_p3, %p966_p2 }
  0x2c   :  { %751 = vmatpush3.bf16.msra.mxu0 %v856_v2  ;;  %763 = vmatpush3.bf16.msra.mxu1 %v861_v5  ;;  %v874_v30 = vld [vmem:[#allocation5 + $0x68] sm:$0xff]   ;;  %v875_v31 = vld [vmem:[#allocation5 + $0x60] sm:$0xff]   ;;  %v876_v32 = vld [vmem:[#allocation5 + $0xd8] sm:$0xff]   ;;  %v596_v2 = vunpack.c.l.bf16 %v1040_v7  ;;  %v697_v5 = vmul.f32 -1.442695, %v597_v3 }
  0x2d   :  { %752 = vmatprep.subr.bf16.mxu0 %v992_v0  ;;  %764 = vmatprep.subr.bf16.mxu1 %v992_v0  ;;  %v877_v33 = vld [vmem:[#allocation5 + $0xd0] sm:$0xff]   ;;  %v878_v34 = vld [vmem:[#allocation5 + $0xc8] sm:$0xff]   ;;  %v879_v35 = vld [vmem:[#allocation5 + $0xc0] sm:$0xff]   ;;  %p969_p5 = pnand %p968_p4, %p962_p1 }
  0x2e   :  { %v880_v36 = vld [vmem:[#allocation5 + $0xb8] sm:$0xff]   ;;  %v660_v37 = vld [vmem:[#allocation7 + $0x1] ss:$0 sm:$0xff]  ;;  %v881_v47 = vld [vmem:[#allocation5 + $0xb0] sm:$0xff]  }
  0x2f   :  { %v882_v48 = vld [vmem:[#allocation5 + $0xa8] sm:$0xff]   ;;  %v883_v49 = vld [vmem:[#allocation5 + $0xa0] sm:$0xff]   ;;  %v884_v50 = vld [vmem:[#allocation5 + $0x118] sm:$0xff]  }
  0x30   :  { %753 = vmatpush3.bf16.msra.mxu0 %v857_v4  ;;  %765 = vmatpush3.bf16.msra.mxu1 %v862_v8  ;;  %v885_v51 = vld [vmem:[#allocation5 + $0x110] sm:$0xff]   ;;  %v886_v52 = vld [vmem:[#allocation5 + $0x108] sm:$0xff]   ;;  %v887_v53 = vld [vmem:[#allocation5 + $0x100] sm:$0xff]   ;;  %v696_v4 = vmul.f32 -1.442695, %v596_v2 }
  0x31   :  { %754 = vmatprep.subr.bf16.mxu0 %v992_v0  ;;  %766 = vmatprep.subr.bf16.mxu1 %v992_v0  ;;  %v888_v54 = vld [vmem:[#allocation5 + $0xf8] sm:$0xff]   ;;  %v669_v55 = vld [vmem:[#allocation7 + $0x2] ss:$0 sm:$0xff] }
  0x32   :  { %893 = vpow2.f32 %v696_v4 }
  0x33   :  { %895 = vpow2.f32 %v697_v5 }
  0x34   :  { %755 = vmatpush3.bf16.msra.mxu0 %v858_v6  ;;  %767 = vmatpush3.bf16.msra.mxu1 %v863_v9 }
  0x35   :  { %780 = vmatprep.subr.bf16.mxu0 %v992_v0  ;;  %768 = vmatprep.subr.bf16.mxu1 %v992_v0 }
  0x37   :  { %757 = vmatmul.mubr.msk.bf16.vlgmr.msra.gmra.mxu0 %vm99_vm1, %v1040_v7 }
  0x38   :  { %796 = vmatprep.mubr.msk.bf16.mxu0 %vm993_vm0, %v992_v0  ;;  %769 = vmatpush3.bf16.msra.mxu1 %v864_v10 }
  0x39   :  { %770 = vmatprep.subr.bf16.mxu1 %v992_v0  ;;  %781 = vmatpush3.bf16.msra.mxu0 %v868_v14 }
  0x3a   :  { %782 = vmatprep.subr.bf16.mxu0 %v992_v0 }
  0x3c   :  { %771 = vmatpush3.bf16.msra.mxu1 %v865_v11  ;;  %v889_v11 = vld [vmem:[#allocation5 + $0xf0] sm:$0xff]  }
  0x3d   :  { %772 = vmatprep.subr.bf16.mxu1 %v992_v0  ;;  %783 = vmatpush3.bf16.msra.mxu0 %v869_v15 }
  0x3e   :  { %784 = vmatprep.subr.bf16.mxu0 %v992_v0 }
  0x3f   :  { %v894_v6 = vpop.eup %893 }
  0x40   :  { %773 = vmatpush3.bf16.msra.mxu1 %v866_v12  ;;  %v896_v8 = vpop.eup %895  ;;  %v604_v9 = vadd.f32 1.0, %v894_v6  ;;  %v890_v12 = vld [vmem:[#allocation5 + $0xe8] sm:$0xff]  }
  0x41   :  { %774 = vmatprep.subr.bf16.mxu1 %v992_v0  ;;  %785 = vmatpush3.bf16.msra.mxu0 %v870_v16  ;;  %v605_v10 = vadd.f32 1.0, %v896_v8  ;;  %v994_v16 = vmov 32  }
  0x42   :  { %786 = vmatprep.subr.bf16.mxu0 %v992_v0  ;;  %897 = vrcp.f32 %v604_v9  ;;  %849 = vset.pattern.permute.xlu0 %v994_v16 }
  0x43   :  { %899 = vrcp.f32 %v605_v10 }
  0x44   :  { %775 = vmatpush3.bf16.msra.mxu1 %v867_v13  ;;  %v891_v13 = vld [vmem:[#allocation5 + $0xe0] sm:$0xff]  }
  0x45   :  { %800 = vmatprep.subr.bf16.mxu1 %v992_v0  ;;  %787 = vmatpush3.bf16.msra.mxu0 %v871_v17  ;;  %v678_v17 = vld [vmem:[#allocation7 + $0x3] ss:$0 sm:$0xff] }
  0x46   :  { %788 = vmatprep.subr.bf16.mxu0 %v992_v0 }
  0x49   :  { %789 = vmatpush3.bf16.msra.mxu0 %v872_v18 }
  0x4a   :  { %790 = vmatprep.subr.bf16.mxu0 %v992_v0 }
  0x4d   :  { %791 = vmatpush3.bf16.msra.mxu0 %v873_v29 }
  0x4e   :  { %792 = vmatprep.subr.bf16.mxu0 %v992_v0 }
  0x4f   :  { %v898_v7 = vpop.eup %897 }
  0x50   :  { %v900_v14 = vpop.eup %899 }
  0x51   :  { %793 = vmatpush3.bf16.msra.mxu0 %v874_v30  ;;  %v850_v15 = vpack.i.bf16 %v900_v14, %v898_v7 }
  0x52   :  { %794 = vmatprep.subr.bf16.mxu0 %v992_v0 }
  0x53   :  { %851 = vperm.xlu0 %849, %v850_v15  }
  0x55   :  { %795 = vmatpush3.bf16.msra.mxu0 %v875_v31 }
  0x56   :  { %820 = vmatprep.subr.bf16.mxu0 %v992_v0 }
  0xf7   :  { %v137_v20 = vpop.f32.mrf.mxu0 }
  0xf8   :  { %v138_v22 = vadd.f32 %v653_v19, %v137_v20 }
  0xf9   :  { %v758_v21 = vpop.f32.mrf.mxu0 }
  0xfa   :  { %v144_v26 = vmax.f32 %v138_v22, 0.0 }
  0xfb   :  { %v140_v23 = vpop.f32.mrf.mxu0 }
  0xfc   :  { %v141_v24 = vadd.f32 %v653_v19, %v140_v23 }
  0xfd   :  { %v759_v25 = vpop.f32.mrf.mxu0 }
  0xfe   :  { %v145_v27 = vmax.f32 %v141_v24, 0.0 }
 0x100   :  { %v146_v28 = vpack.c.bf16 %v145_v27, %v144_v26  ;;  %v852_v27 = vpop.permute.xlu0 %851 }
 0x102   :  { %777 = vmatmul.mubr.bf16.vlgmr.msra.gmra.mxu1 %v146_v28  ;;  %v687_v28 = vld [vmem:[#allocation7 + $0x4] ss:$0 sm:$0xff] }
 0x103   :  { %816 = vmatprep.mubr.msk.bf16.mxu1 %vm993_vm0, %v992_v0  ;;  %801 = vmatpush3.bf16.msra.mxu1 %v876_v32  ;;  %v854_v32 = vunpack.i.h.bf16 %v852_v27 }
 0x104   :  { %802 = vmatprep.subr.bf16.mxu1 %v992_v0 }
 0x107   :  { %803 = vmatpush3.bf16.msra.mxu1 %v877_v33  ;;  %v853_v33 = vunpack.i.l.bf16 %v852_v27 }
 0x108   :  { %804 = vmatprep.subr.bf16.mxu1 %v992_v0 }
 0x10b   :  { %805 = vmatpush3.bf16.msra.mxu1 %v878_v34 }
 0x10c   :  { %806 = vmatprep.subr.bf16.mxu1 %v992_v0 }
 0x10f   :  { %807 = vmatpush3.bf16.msra.mxu1 %v879_v35 }
 0x110   :  { %808 = vmatprep.subr.bf16.mxu1 %v992_v0 }
 0x113   :  { %809 = vmatpush3.bf16.msra.mxu1 %v880_v36 }
 0x114   :  { %810 = vmatprep.subr.bf16.mxu1 %v992_v0 }
 0x117   :  { %811 = vmatpush3.bf16.msra.mxu1 %v881_v47 }
 0x118   :  { %812 = vmatprep.subr.bf16.mxu1 %v992_v0 }
 0x11b   :  { %813 = vmatpush3.bf16.msra.mxu1 %v882_v48 }
 0x11c   :  { %814 = vmatprep.subr.bf16.mxu1 %v992_v0 }
 0x11f   :  { %815 = vmatpush3.bf16.msra.mxu1 %v883_v49 }
 0x1c2   :  { %v250_v38 = vpop.f32.mrf.mxu1 }
 0x1c3   :  { %v251_v40 = vadd.f32 %v660_v37, %v250_v38 }
 0x1c4   :  { %v778_v39 = vpop.f32.mrf.mxu1 }
 0x1c5   :  { %v257_v44 = vmax.f32 %v251_v40, 0.0 }
 0x1c6   :  { %v253_v41 = vpop.f32.mrf.mxu1 }
 0x1c7   :  { %v254_v42 = vadd.f32 %v660_v37, %v253_v41 }
 0x1c8   :  { %v779_v43 = vpop.f32.mrf.mxu1 }
 0x1c9   :  { %v258_v45 = vmax.f32 %v254_v42, 0.0 }
 0x1cb   :  { %v259_v46 = vpack.c.bf16 %v258_v45, %v257_v44 }
 0x1cd   :  { %797 = vmatmul.mubr.bf16.vlgmr.msra.gmra.mxu0 %v259_v46 }
 0x1ce   :  { %836 = vmatprep.mubr.msk.bf16.mxu0 %vm993_vm0, %v992_v0  ;;  %821 = vmatpush3.bf16.msra.mxu0 %v884_v50 }
 0x1cf   :  { %822 = vmatprep.subr.bf16.mxu0 %v992_v0 }
 0x1d2   :  { %823 = vmatpush3.bf16.msra.mxu0 %v885_v51 }
 0x1d3   :  { %824 = vmatprep.subr.bf16.mxu0 %v992_v0 }
 0x1d6   :  { %825 = vmatpush3.bf16.msra.mxu0 %v886_v52 }
 0x1d7   :  { %826 = vmatprep.subr.bf16.mxu0 %v992_v0 }
 0x1da   :  { %827 = vmatpush3.bf16.msra.mxu0 %v887_v53 }
 0x1db   :  { %828 = vmatprep.subr.bf16.mxu0 %v992_v0 }
 0x1de   :  { %829 = vmatpush3.bf16.msra.mxu0 %v888_v54 }
 0x1df   :  { %830 = vmatprep.subr.bf16.mxu0 %v992_v0 }
 0x1e2   :  { %831 = vmatpush3.bf16.msra.mxu0 %v889_v11 }
 0x1e3   :  { %832 = vmatprep.subr.bf16.mxu0 %v992_v0 }
 0x1e6   :  { %833 = vmatpush3.bf16.msra.mxu0 %v890_v12 }
 0x1e7   :  { %834 = vmatprep.subr.bf16.mxu0 %v992_v0  ;;  %v610_v0 = vlaneseq }
 0x1e9   :  { %v611_v30 = vand.u32 127, %v610_v0 }
 0x1ea   :  { %835 = vmatpush3.bf16.msra.mxu0 %v891_v13 }
 0x1eb   :  { %vm612_vm2 = vcmp.eq.s32.totalorder %v611_v30, 8 }
 0x28d   :  { %v363_v56 = vpop.f32.mrf.mxu0 }
 0x28e   :  { %v364_v58 = vadd.f32 %v669_v55, %v363_v56 }
 0x28f   :  { %v798_v57 = vpop.f32.mrf.mxu0 }
 0x290   :  { %v370_v62 = vmax.f32 %v364_v58, 0.0 }
 0x291   :  { %v366_v59 = vpop.f32.mrf.mxu0 }
 0x292   :  { %v367_v60 = vadd.f32 %v669_v55, %v366_v59 }
 0x293   :  { %v799_v61 = vpop.f32.mrf.mxu0 }
 0x294   :  { %v371_v63 = vmax.f32 %v367_v60, 0.0 }
 0x296   :  { %v372_v1 = vpack.c.bf16 %v371_v63, %v370_v62 }
 0x298   :  { %817 = vmatmul.mubr.bf16.vlgmr.msra.gmra.mxu1 %v372_v1 }
 0x358   :  { %v476_v18 = vpop.f32.mrf.mxu1 }
 0x359   :  { %v477_v20 = vadd.f32 %v678_v17, %v476_v18 }
 0x35a   :  { %v818_v19 = vpop.f32.mrf.mxu1 }
 0x35b   :  { %v483_v24 = vmax.f32 %v477_v20, 0.0 }
 0x35c   :  { %v479_v21 = vpop.f32.mrf.mxu1 }
 0x35d   :  { %v480_v22 = vadd.f32 %v678_v17, %v479_v21 }
 0x35e   :  { %v819_v23 = vpop.f32.mrf.mxu1 }
 0x35f   :  { %v484_v25 = vmax.f32 %v480_v22, 0.0 }
 0x361   :  { %v485_v26 = vpack.c.bf16 %v484_v25, %v483_v24 }
 0x363   :  { %837 = vmatmul.mubr.bf16.vlgmr.msra.gmra.mxu0 %v485_v26 }
 0x423   :  { %v589_v29 = vpop.f32.mrf.mxu0 }
 0x424   :  { %v590_v34 = vadd.f32 %v687_v28, %v589_v29 }
 0x425   :  { %v838_v31 = vpop.f32.mrf.mxu0 }
 0x426   :  { %v623_v38 = vsel %vm612_vm2, %v853_v33, %v590_v34 }
 0x427   :  { %v592_v35 = vpop.f32.mrf.mxu0 }
 0x428   :  { %v593_v36 = vadd.f32 %v687_v28, %v592_v35 }
 0x429   :  { %v839_v37 = vpop.f32.mrf.mxu0 }
 0x42a   :  { %v624_v39 = vsel %vm612_vm2, %v854_v32, %v593_v36 }
 0x42b   :  { %v705_v40 = vpack.c.bf16 %v624_v39, %v623_v38 }
 0x42d   :  { %706 = vst [vmem:[#allocation8] sm:$0xff] %v705_v40  }
 0x42e   :  { %972 = shalt.err (!%p969_p5)
}
 0x42f   :  { %646 = dma.vmem_to_hbm [thread:$0]  %s641_s2, 128, %s1091_s3, [#allocation4], %s989_s17, %s989_s17, %s990_s18  }
 0x430   :  { %985 = dma.done.wait [#allocation4], 128  }
 0x431   :  { %986 = vsyncadd [#allocation4], 4294967168 }
 0x432   :  { %650 = vsyncpa [#allocation3], 1 }
 0x433   :  { %651 = vsyncpa [#allocation6], 1 }
 0x434   :  { %652 = vsyncpa [#allocation4], 1 }

</bundles_post_ra>
